<compile_context>
chip_gen: v7x
topology: tpu7x:2x2x1
jax: 0.10.0
libtpu: 0.0.40
codegen_flags: <defaults>
</compile_context>

<pallas_src>
from collections import namedtuple
from functools import partial

import numpy as np
import jax
import jax.numpy as jnp
from jax import lax
from jax.experimental import pallas as pl
from jax.experimental.pallas import tpu as pltpu

Graph = namedtuple("Graph", ["batch_num_nodes"])


# ----------------------------------------------------------------------------
# helpers
# ----------------------------------------------------------------------------
def _round_up(v, m):
    return ((v + m - 1) // m) * m


def _pick_row_tile(n, hp, override=None):
    if override is not None:
        return max(8, _round_up(int(override), 8))
    tile = min(1024, _round_up(n, 8))
    # keep each (double-buffered) f32 input block ~2 MiB so it fits the scoped
    # VMEM limit comfortably on v5e (16 MiB default) and v7x (64 MiB physical).
    budget_rows = max(8, ((2 * 1024 * 1024) // (hp * 4)) // 8 * 8)
    return max(8, min(tile, budget_rows))


def _cparams(sem):
    return pltpu.CompilerParams(
        dimension_semantics=(sem,),
        vmem_limit_bytes=32 * 1024 * 1024,
    )


def _pad_lanes(a, hp):
    h = a.shape[-1]
    return a if h == hp else jnp.pad(a, ((0, 0), (0, hp - h)))


# ----------------------------------------------------------------------------
# GraphNorm kernels (grid over node-row tiles)
# ----------------------------------------------------------------------------
def _gn_mean_kernel(x_ref, starts_ref, ends_ref, inv_cnt_ref, ms_ref, o_ref, *, n_rows):
    """Accumulate per-graph sum(x); finalize to mean * mean_scale on (Gp, Hp)."""
    t = pl.program_id(0)

    @pl.when(t == 0)
    def _():
        o_ref[...] = jnp.zeros_like(o_ref)

    tile = x_ref.shape[0]
    row = t * tile + lax.broadcasted_iota(jnp.int32, (tile, 1), 0)        # (tile, 1)
    x = jnp.where(row < n_rows, x_ref[...].astype(jnp.float32), 0.0)      # drop OOB rows
    member = jnp.logical_and(row >= starts_ref[...], row < ends_ref[...])  # (tile, Gp)
    member = member.astype(jnp.float32)
    # segment partial sum: contract over the row axis (no transpose materialized)
    o_ref[...] += lax.dot_general(member, x, (((0,), (0,)), ((), ())),
                                  preferred_element_type=jnp.float32)

    @pl.when(t == pl.num_programs(0) - 1)
    def _():
        # mean * mean_scale computed on the tiny (Gp, Hp) tile
        o_ref[...] = o_ref[...] * inv_cnt_ref[...] * ms_ref[...]


def _gn_var_kernel(x_ref, starts_ref, ends_ref, sm_ref, inv_cnt_ref, o_ref, *, n_rows):
    """Accumulate per-graph sum(sub^2); finalize to inv_std = rsqrt(var + 1e-6)."""
    t = pl.program_id(0)

    @pl.when(t == 0)
    def _():
        o_ref[...] = jnp.zeros_like(o_ref)

    tile = x_ref.shape[0]
    row = t * tile + lax.broadcasted_iota(jnp.int32, (tile, 1), 0)
    x = jnp.where(row < n_rows, x_ref[...].astype(jnp.float32), 0.0)
    member = jnp.logical_and(row >= starts_ref[...], row < ends_ref[...]).astype(jnp.float32)
    mean_b = jnp.dot(member, sm_ref[...], preferred_element_type=jnp.float32)  # (tile, Hp)
    sub = x - mean_b
    o_ref[...] += lax.dot_general(member, sub * sub, (((0,), (0,)), ((), ())),
                                  preferred_element_type=jnp.float32)

    @pl.when(t == pl.num_programs(0) - 1)
    def _():
        o_ref[...] = lax.rsqrt(o_ref[...] * inv_cnt_ref[...] + 1e-6)


def _gn_apply_kernel(x_ref, starts_ref, ends_ref, stats_ref, w_ref, b_ref, o_ref):
    """out = w * (x - mean*ms) * inv_std + b  (fused broadcast-back matmul)."""
    t = pl.program_id(0)
    tile = x_ref.shape[0]
    hp = stats_ref.shape[1] // 2
    row = t * tile + lax.broadcasted_iota(jnp.int32, (tile, 1), 0)
    member = jnp.logical_and(row >= starts_ref[...], row < ends_ref[...]).astype(jnp.float32)
    bcast = jnp.dot(member, stats_ref[...], preferred_element_type=jnp.float32)  # (tile, 2*Hp)
    mean_b = bcast[:, :hp]
    inv_std_b = bcast[:, hp:]
    x = x_ref[...].astype(jnp.float32)
    o_ref[...] = (w_ref[...] * (x - mean_b) * inv_std_b + b_ref[...]).astype(o_ref.dtype)


# ----------------------------------------------------------------------------
# LayerNorm kernel (grid over node-row tiles, fully parallel)
# ----------------------------------------------------------------------------
def _layernorm_kernel(x_ref, w_ref, b_ref, o_ref, *, h_valid):
    x = x_ref[...].astype(jnp.float32)
    hp = x.shape[-1]
    inv_h = 1.0 / h_valid
    mean = jnp.sum(x, axis=-1, keepdims=True) * inv_h   # padded lanes are zero
    centered = x - mean
    if hp != h_valid:
        lane = lax.broadcasted_iota(jnp.int32, (1, hp), 1)
        centered = jnp.where(lane < h_valid, centered, 0.0)
    var = jnp.sum(centered * centered, axis=-1, keepdims=True) * inv_h
    y = centered * lax.rsqrt(var + 1e-5)
    o_ref[...] = (y * w_ref[...] + b_ref[...]).astype(o_ref.dtype)


# ----------------------------------------------------------------------------
# BatchNorm kernels (two-phase: streaming stats accumulator, then apply)
# ----------------------------------------------------------------------------
def _bn_stats_kernel(x_ref, o_ref, *, n_rows):
    t = pl.program_id(0)

    @pl.when(t == 0)
    def _():
        o_ref[...] = jnp.zeros_like(o_ref)

    tile = x_ref.shape[0]
    row = t * tile + lax.broadcasted_iota(jnp.int32, (tile, 1), 0)
    x = jnp.where(row < n_rows, x_ref[...].astype(jnp.float32), 0.0)
    s1 = jnp.sum(x, axis=0, keepdims=True)        # (1, Hp)
    s2 = jnp.sum(x * x, axis=0, keepdims=True)    # (1, Hp)
    o_ref[0:1, :] = o_ref[0:1, :] + s1
    o_ref[1:2, :] = o_ref[1:2, :] + s2

    @pl.when(t == pl.num_programs(0) - 1)
    def _():
        inv_n = 1.0 / n_rows
        mean = o_ref[0:1, :] * inv_n
        ex2 = o_ref[1:2, :] * inv_n
        inv_std = lax.rsqrt(ex2 - mean * mean + 1e-5)
        o_ref[0:1, :] = mean
        o_ref[1:2, :] = inv_std


def _bn_apply_kernel(x_ref, stats_ref, w_ref, b_ref, o_ref):
    x = x_ref[...].astype(jnp.float32)
    mean = stats_ref[0:1, :]
    inv_std = stats_ref[1:2, :]
    o_ref[...] = ((x - mean) * inv_std * w_ref[...] + b_ref[...]).astype(o_ref.dtype)


# ----------------------------------------------------------------------------
# Module wrapper
# ----------------------------------------------------------------------------
class NormLayer:
    """JAX/Pallas port of utils.utils.NormLayer (deterministic default init)."""

    def __init__(self, hidden_dim, norm_type, row_tile=None):
        if norm_type not in ("batchnorm", "layernorm", "graphnorm"):
            raise NotImplementedError
        self.hidden_dim = hidden_dim
        self.norm_type = norm_type
        self.row_tile = row_tile
        self.weight = jnp.ones((1, hidden_dim), jnp.float32)
        self.bias = jnp.zeros((1, hidden_dim), jnp.float32)
        if norm_type == "graphnorm":
            self.mean_scale = jnp.ones((1, hidden_dim), jnp.float32)
        # TODO(synk): nn.BatchNorm1d running_mean/running_var buffer updates are a
        # training-time side effect and are not modeled (forward output matches).

    def __call__(self, graph, x):
        n, h = x.shape
        assert h == self.hidden_dim
        hp = _round_up(h, 128)                     # lane-dense output blocks
        tile = _pick_row_tile(n, hp, self.row_tile)
        nt = -(-n // tile)

        xp = _pad_lanes(x, hp)
        wp = _pad_lanes(self.weight, hp)
        bp = _pad_lanes(self.bias, hp)

        x_spec = pl.BlockSpec((tile, hp), lambda t: (t, 0))
        param_spec = pl.BlockSpec((1, hp), lambda t: (0, 0))
        out_shape = jax.ShapeDtypeStruct((n, hp), x.dtype)

        if self.norm_type == "layernorm":
            out_p = pl.pallas_call(
                partial(_layernorm_kernel, h_valid=h),
                out_shape=out_shape,
                grid_spec=pltpu.PrefetchScalarGridSpec(
                    num_scalar_prefetch=0, grid=(nt,),
                    in_specs=[x_spec, param_spec, param_spec],
                    out_specs=x_spec),
                compiler_params=_cparams("parallel"),
            )(xp, wp, bp)
            return out_p[:, :h] if hp != h else out_p

        if self.norm_type == "batchnorm":
            stats_spec = pl.BlockSpec((2, hp), lambda t: (0, 0))
            stats = pl.pallas_call(
                partial(_bn_stats_kernel, n_rows=n),
                out_shape=jax.ShapeDtypeStruct((2, hp), jnp.float32),
                grid_spec=pltpu.PrefetchScalarGridSpec(
                    num_scalar_prefetch=0, grid=(nt,),
                    in_specs=[x_spec],
                    out_specs=stats_spec),
                compiler_params=_cparams("arbitrary"),
            )(xp)
            out_p = pl.pallas_call(
                _bn_apply_kernel,
                out_shape=out_shape,
                grid_spec=pltpu.PrefetchScalarGridSpec(
                    num_scalar_prefetch=0, grid=(nt,),
                    in_specs=[x_spec, stats_spec, param_spec, param_spec],
                    out_specs=x_spec),
                compiler_params=_cparams("parallel"),
            )(xp, stats, wp, bp)
            return out_p[:, :h] if hp != h else out_p

        # ---------------- graphnorm ----------------
        counts = np.asarray(graph.batch_num_nodes, dtype=np.int64)
        g = counts.shape[0]
        assert int(counts.sum()) == n
        gp = _round_up(g, 128)

        offsets = np.zeros(g + 1, dtype=np.int64)
        offsets[1:] = np.cumsum(counts)
        starts_np = np.zeros((1, gp), np.int32)
        ends_np = np.zeros((1, gp), np.int32)      # padded graphs: [0, 0) -> no rows
        starts_np[0, :g] = offsets[:-1]
        ends_np[0, :g] = offsets[1:]
        inv_cnt_np = np.zeros((gp, 1), np.float32)
        inv_cnt_np[:g, 0] = np.where(counts > 0, 1.0 / np.maximum(counts, 1), 0.0)

        starts = jnp.asarray(starts_np)
        ends = jnp.asarray(ends_np)
        inv_cnt = jnp.asarray(inv_cnt_np)
        msp = _pad_lanes(self.mean_scale, hp)

        seg_spec = pl.BlockSpec((1, gp), lambda t: (0, 0))
        cnt_spec = pl.BlockSpec((gp, 1), lambda t: (0, 0))
        stat_spec = pl.BlockSpec((gp, hp), lambda t: (0, 0))

        # pass 1: per-graph mean * mean_scale   (Gp, Hp)
        scaled_mean = pl.pallas_call(
            partial(_gn_mean_kernel, n_rows=n),
            out_shape=jax.ShapeDtypeStruct((gp, hp), jnp.float32),
            grid_spec=pltpu.PrefetchScalarGridSpec(
                num_scalar_prefetch=0, grid=(nt,),
                in_specs=[x_spec, seg_spec, seg_spec, cnt_spec, param_spec],
                out_specs=stat_spec),
            compiler_params=_cparams("arbitrary"),
        )(xp, starts, ends, inv_cnt, msp)

        # pass 2: per-graph inv_std of sub      (Gp, Hp)
        inv_std = pl.pallas_call(
            partial(_gn_var_kernel, n_rows=n),
            out_shape=jax.ShapeDtypeStruct((gp, hp), jnp.float32),
            grid_spec=pltpu.PrefetchScalarGridSpec(
                num_scalar_prefetch=0, grid=(nt,),
                in_specs=[x_spec, seg_spec, seg_spec, stat_spec, cnt_spec],
                out_specs=stat_spec),
            compiler_params=_cparams("arbitrary"),
        )(xp, starts, ends, scaled_mean, inv_cnt)

        # fuse the two broadcast-backs into a single (Gp, 2*Hp) operand
        stats = jnp.concatenate([scaled_mean, inv_std], axis=1)
        stats_spec = pl.BlockSpec((gp, 2 * hp), lambda t: (0, 0))

        # pass 3: apply  out = w * (x - mean*ms) * inv_std + b
        out_p = pl.pallas_call(
            _gn_apply_kernel,
            out_shape=out_shape,
            grid_spec=pltpu.PrefetchScalarGridSpec(
                num_scalar_prefetch=0, grid=(nt,),
                in_specs=[x_spec, seg_spec, seg_spec, stats_spec, param_spec, param_spec],
                out_specs=x_spec),
            compiler_params=_cparams("parallel"),
        )(xp, starts, ends, stats, wp, bp)
        return out_p[:, :h] if hp != h else out_p


# ----------------------------------------------------------------------------
# numpy references for verification
# ----------------------------------------------------------------------------
def _graphnorm_ref(x, counts, weight, bias, mean_scale):
    counts = np.asarray(counts)
    idx = np.repeat(np.arange(len(counts)), counts)
    x = np.asarray(x, np.float32)
    g = len(counts)
    mean = np.zeros((g, x.shape[1]), np.float32)
    np.add.at(mean, idx, x)
    mean = mean / counts[:, None]
    sub = x - mean[idx] * np.asarray(mean_scale)
    std = np.zeros((g, x.shape[1]), np.float32)
    np.add.at(std, idx, sub ** 2)
    std = np.sqrt(std / counts[:, None] + 1e-6)
    return np.asarray(weight) * sub / std[idx] + np.asarray(bias)


def _layernorm_ref(x, w, b):
    x = np.asarray(x, np.float32)
    m = x.mean(-1, keepdims=True)
    v = ((x - m) ** 2).mean(-1, keepdims=True)
    return (x - m) / np.sqrt(v + 1e-5) * np.asarray(w) + np.asarray(b)


def _batchnorm_ref(x, w, b):
    x = np.asarray(x, np.float32)
    m = x.mean(0, keepdims=True)
    v = ((x - m) ** 2).mean(0, keepdims=True)
    return (x - m) / np.sqrt(v + 1e-5) * np.asarray(w) + np.asarray(b)


# ----------------------------------------------------------------------------
if __name__ == "__main__":
    hidden_dim = 32
    batch_num_nodes = [13, 24, 11, 13]          # 4 graphs, 61 nodes
    n_nodes = sum(batch_num_nodes)
    graph = Graph(batch_num_nodes=batch_num_nodes)

    key = jax.random.PRNGKey(0)
    x = jax.random.normal(key, (n_nodes, hidden_dim), dtype=jnp.float32)

    # small row tile so the grid has several steps (exercises accumulators,
    # resident stats, graphs spanning tiles, and the partial last block)
    row_tile = 16
    tol = dict(rtol=5e-5, atol=5e-5)

    # --- graphnorm ---
    gn = NormLayer(hidden_dim, "graphnorm", row_tile=row_tile)
    out_gn = jax.block_until_ready(gn(graph, x))
    ref_gn = _graphnorm_ref(x, batch_num_nodes, gn.weight, gn.bias, gn.mean_scale)
    np.testing.assert_allclose(np.asarray(out_gn), ref_gn, **tol)

    # --- layernorm ---
    ln = NormLayer(hidden_dim, "layernorm", row_tile=row_tile)
    out_ln = jax.block_until_ready(ln(graph, x))
    np.testing.assert_allclose(np.asarray(out_ln),
                               _layernorm_ref(x, ln.weight, ln.bias), **tol)

    # --- batchnorm (training-mode batch statistics) ---
    bn = NormLayer(hidden_dim, "batchnorm", row_tile=row_tile)
    out_bn = jax.block_until_ready(bn(graph, x))
    np.testing.assert_allclose(np.asarray(out_bn),
                               _batchnorm_ref(x, bn.weight, bn.bias), **tol)

    print("KERNEL_OK")
</pallas_src>

<mosaic_0001>
module attributes {stable_mosaic.version = 11 : i64} {
  func.func @_gn_mean_kernel(%arg0: i32, %arg1: memref<16x128xf32, #tpu.memory_space<vmem>>, %arg2: memref<1x128xi32, #tpu.memory_space<vmem>>, %arg3: memref<1x128xi32, #tpu.memory_space<vmem>>, %arg4: memref<128x1xf32, #tpu.memory_space<vmem>>, %arg5: memref<1x128xf32, #tpu.memory_space<vmem>>, %arg6: memref<128x128xf32, #tpu.memory_space<vmem>>) attributes {dimension_semantics = [#tpu.dimension_semantics<arbitrary>], iteration_bounds = array<i64: 4>, scalar_prefetch = 0 : i64, scratch_operands = 0 : i64, tpu.core_type = #tpu.core_type<tc>, window_params = [{transform_indices = @transform_0, window_bounds = array<i64: 16, 128>}, {pipeline_mode = #tpu.pipeline_mode<synchronous>, transform_indices = @transform_1, window_bounds = array<i64: 1, 128>}, {pipeline_mode = #tpu.pipeline_mode<synchronous>, transform_indices = @transform_2, window_bounds = array<i64: 1, 128>}, {pipeline_mode = #tpu.pipeline_mode<synchronous>, transform_indices = @transform_3, window_bounds = array<i64: 128, 1>}, {pipeline_mode = #tpu.pipeline_mode<synchronous>, transform_indices = @transform_4, window_bounds = array<i64: 1, 128>}, {pipeline_mode = #tpu.pipeline_mode<synchronous>, transform_indices = @transform_5, window_bounds = array<i64: 128, 128>}]} {
    %c0_i32 = arith.constant 0 : i32
    %0 = arith.cmpi eq, %arg0, %c0_i32 : i32
    %1 = arith.extui %0 : i1 to i32
    %c0_i32_0 = arith.constant 0 : i32
    %2 = arith.cmpi ne, %1, %c0_i32_0 : i32
    scf.if %2 {
      %cst_12 = arith.constant 0.000000e+00 : f32
      %32 = vector.broadcast %cst_12 : f32 to vector<128x128xf32>
      %c0_13 = arith.constant 0 : index
      %c0_14 = arith.constant 0 : index
      %33 = vector.load %arg6[%c0_13, %c0_14] : memref<128x128xf32, #tpu.memory_space<vmem>>, vector<128x128xf32>
      tpu.vector_store %arg6[%c0_13, %c0_14], %32 {strides = array<i32>} : memref<128x128xf32, #tpu.memory_space<vmem>>, vector<128x128xf32>,
    } else {
    }
    %c16_i32 = arith.constant 16 : i32
    %3 = arith.muli %arg0, %c16_i32 : i32
    %4 = tpu.iota {dimensions = array<i32: 0>} : vector<16x1xi32>
    %5 = vector.broadcast %3 : i32 to vector<16x1xi32>
    %6 = arith.addi %5, %4 : vector<16x1xi32>
    %c61_i32 = arith.constant 61 : i32
    %7 = vector.broadcast %c61_i32 : i32 to vector<16x1xi32>
    %8 = arith.cmpi slt, %6, %7 : vector<16x1xi32>
    %c0 = arith.constant 0 : index
    %c0_1 = arith.constant 0 : index
    %9 = vector.load %arg1[%c0, %c0_1] : memref<16x128xf32, #tpu.memory_space<vmem>>, vector<16x128xf32>
    %cst = arith.constant 0.000000e+00 : f32
    %10 = vector.shape_cast %8 : vector<16x1xi1> to vector<16x1xi1>
    %11 = vector.broadcast %10 : vector<16x1xi1> to vector<16x128xi1>
    %12 = vector.broadcast %cst : f32 to vector<16x128xf32>
    %13 = arith.select %11, %9, %12 : vector<16x128xi1>, vector<16x128xf32>
    %c0_2 = arith.constant 0 : index
    %c0_3 = arith.constant 0 : index
    %14 = vector.load %arg2[%c0_2, %c0_3] : memref<1x128xi32, #tpu.memory_space<vmem>>, vector<1x128xi32>
    %15 = vector.broadcast %6 : vector<16x1xi32> to vector<16x128xi32>
    %16 = vector.broadcast %14 : vector<1x128xi32> to vector<16x128xi32>
    %17 = arith.cmpi sge, %15, %16 : vector<16x128xi32>
    %c0_4 = arith.constant 0 : index
    %c0_5 = arith.constant 0 : index
    %18 = vector.load %arg3[%c0_4, %c0_5] : memref<1x128xi32, #tpu.memory_space<vmem>>, vector<1x128xi32>
    %19 = vector.broadcast %6 : vector<16x1xi32> to vector<16x128xi32>
    %20 = vector.broadcast %18 : vector<1x128xi32> to vector<16x128xi32>
    %21 = arith.cmpi slt, %19, %20 : vector<16x128xi32>
    %22 = arith.andi %17, %21 : vector<16x128xi1>
    %23 = arith.extui %22 : vector<16x128xi1> to vector<16x128xi32>
    %24 = arith.sitofp %23 : vector<16x128xi32> to vector<16x128xf32>
    %c0_6 = arith.constant 0 : index
    %c0_7 = arith.constant 0 : index
    %25 = vector.load %arg6[%c0_6, %c0_7] : memref<128x128xf32, #tpu.memory_space<vmem>>, vector<128x128xf32>
    %cst_8 = arith.constant dense<0.000000e+00> : vector<128x128xf32>
    %26 = tpu.matmul %24, %13, %cst_8 {dimension_numbers = #tpu.dot_dimension_numbers<[0], [0], [1], [1], [0, 1, 1, 1], [], []>} : vector<16x128xf32>, vector<16x128xf32>, vector<128x128xf32> -> vector<128x128xf32>
    %27 = arith.addf %25, %26 : vector<128x128xf32>
    %c0_9 = arith.constant 0 : index
    %c0_10 = arith.constant 0 : index
    %28 = vector.load %arg6[%c0_9, %c0_10] : memref<128x128xf32, #tpu.memory_space<vmem>>, vector<128x128xf32>
    tpu.vector_store %arg6[%c0_9, %c0_10], %27 {strides = array<i32>} : memref<128x128xf32, #tpu.memory_space<vmem>>, vector<128x128xf32>,
    %c3_i32 = arith.constant 3 : i32
    %29 = arith.cmpi eq, %arg0, %c3_i32 : i32
    %30 = arith.extui %29 : i1 to i32
    %c0_i32_11 = arith.constant 0 : i32
    %31 = arith.cmpi ne, %30, %c0_i32_11 : i32
    scf.if %31 {
      %c0_12 = arith.constant 0 : index
      %c0_13 = arith.constant 0 : index
      %32 = vector.load %arg6[%c0_12, %c0_13] : memref<128x128xf32, #tpu.memory_space<vmem>>, vector<128x128xf32>
      %c0_14 = arith.constant 0 : index
      %c0_15 = arith.constant 0 : index
      %33 = vector.load %arg4[%c0_14, %c0_15] : memref<128x1xf32, #tpu.memory_space<vmem>>, vector<128x1xf32>
      %34 = vector.broadcast %33 : vector<128x1xf32> to vector<128x128xf32>
      %35 = arith.mulf %32, %34 : vector<128x128xf32>
      %c0_16 = arith.constant 0 : index
      %c0_17 = arith.constant 0 : index
      %36 = vector.load %arg5[%c0_16, %c0_17] : memref<1x128xf32, #tpu.memory_space<vmem>>, vector<1x128xf32>
      %37 = vector.broadcast %36 : vector<1x128xf32> to vector<128x128xf32>
      %38 = arith.mulf %35, %37 : vector<128x128xf32>
      %c0_18 = arith.constant 0 : index
      %c0_19 = arith.constant 0 : index
      %39 = vector.load %arg6[%c0_18, %c0_19] : memref<128x128xf32, #tpu.memory_space<vmem>>, vector<128x128xf32>
      tpu.vector_store %arg6[%c0_18, %c0_19], %38 {strides = array<i32>} : memref<128x128xf32, #tpu.memory_space<vmem>>, vector<128x128xf32>,
    } else {
    }
    return
  }
  func.func @transform_0(%arg0: i32) -> (i32, i32) {
    %c0_i32 = arith.constant 0 : i32
    %c0_i32_0 = arith.constant 0 : i32
    return %arg0, %c0_i32 : i32, i32
  }
  func.func @transform_1(%arg0: i32) -> (i32, i32) {
    %c0_i32 = arith.constant 0 : i32
    %c0_i32_0 = arith.constant 0 : i32
    %c0_i32_1 = arith.constant 0 : i32
    return %c0_i32, %c0_i32_0 : i32, i32
  }
  func.func @transform_2(%arg0: i32) -> (i32, i32) {
    %c0_i32 = arith.constant 0 : i32
    %c0_i32_0 = arith.constant 0 : i32
    %c0_i32_1 = arith.constant 0 : i32
    return %c0_i32, %c0_i32_0 : i32, i32
  }
  func.func @transform_3(%arg0: i32) -> (i32, i32) {
    %c0_i32 = arith.constant 0 : i32
    %c0_i32_0 = arith.constant 0 : i32
    %c0_i32_1 = arith.constant 0 : i32
    return %c0_i32, %c0_i32_0 : i32, i32
  }
  func.func @transform_4(%arg0: i32) -> (i32, i32) {
    %c0_i32 = arith.constant 0 : i32
    %c0_i32_0 = arith.constant 0 : i32
    %c0_i32_1 = arith.constant 0 : i32
    return %c0_i32, %c0_i32_0 : i32, i32
  }
  func.func @transform_5(%arg0: i32) -> (i32, i32) {
    %c0_i32 = arith.constant 0 : i32
    %c0_i32_0 = arith.constant 0 : i32
    %c0_i32_1 = arith.constant 0 : i32
    return %c0_i32, %c0_i32_0 : i32, i32
  }
}

</mosaic_0001>

<bundles_post_ra>
// kernel: tpu_custom_call.1
= control target key start
LH: loop header
LB: loop body
LE: loop exit
PB: predicated region body
PF: predicated region fallthrough
CT: control target
= control target key end

     0   :  { %10 = vsyncpa [#allocation3], 0  ;;  %s949_s18 = smov 0   ;;  %s1087_s0 = inlined_call_operand.vmem [shape: f32[61,128], index: 0, kind: input, shape index: {}]   ;;  %s1088_s1 = inlined_call_operand.vmem [shape: s32[1,128], index: 1, kind: input, shape index: {}]   ;;  %s1089_s2 = inlined_call_operand.vmem [shape: s32[1,128], index: 2, kind: input, shape index: {}]   ;;  %s1090_s3 = inlined_call_operand.vmem [shape: f32[128,1], index: 3, kind: input, shape index: {}]   ;;  %s1091_s4 = inlined_call_operand.vmem [shape: f32[1,128], index: 4, kind: input, shape index: {}]   ;;  %s1092_s5 = inlined_call_operand.hbm [shape: f32[128,128], index: 5, kind: output, shape index: {}]  }
   0x1 LB: > { %s955_s19 = sadd.s32 4294967295, %s911_s18   ;;  %p766_p0 = scmp.ge.s32.totalorder %s911_s18, 1  ;;  %s911_s18 = sphi %s949_s18, %s16_s18  }
   0x2   : > { %p184_p1 = scmp.lt.s32.totalorder %s911_s18, 5 }
   0x4   : > { %p185_p2 = pnand %p766_p0, %p184_p1 }
   0x5   : > { %s767_s20 = sshll.u32 (!%p185_p2), %s955_s19, 1  ;;  %p769_p4 = scmp.ne.s32.totalorder (!%p185_p2), %s955_s19, 0 }
   0x6   : > { %188 = sbr.rel (%p185_p2) target bundleno = 537 (0x219), region = 40  ;;  %p208_p3 = scmp.lt.s32.totalorder (!%p185_p2), %s767_s20, 7 }
   0xd   : > { %s1094_s20 = smov (!%p208_p3, %s767_s20), 7  ;;  %216 = sbr.rel (%p769_p4) target bundleno = 23 (0x17), region = 44 }
   0xe   : > { %s768_s21 = sshll.u32 %s1094_s20, 3  ;;  %v913_v0 = vmov (!%p769_p4), 0.0  }
   0xf   : > { %s963_s24 = scalar_lea.vmem %s1087_s0, %s768_s21  ;;  %217 = vst [vmem:[#allocation2] sm:$0xff] (!%p769_p4), %v913_v0  ;;  %218 = vst [vmem:[#allocation2 + $0x8] sm:$0xff] (!%p769_p4), %v913_v0 }
  0x10   : > { %219 = vst [vmem:[#allocation2 + $0x10] sm:$0xff] (!%p769_p4), %v913_v0  ;;  %220 = vst [vmem:[#allocation2 + $0x18] sm:$0xff] (!%p769_p4), %v913_v0 }
  0x11   : > { %221 = vst [vmem:[#allocation2 + $0x20] sm:$0xff] (!%p769_p4), %v913_v0  ;;  %222 = vst [vmem:[#allocation2 + $0x28] sm:$0xff] (!%p769_p4), %v913_v0 }
  0x12   : > { %223 = vst [vmem:[#allocation2 + $0x30] sm:$0xff] (!%p769_p4), %v913_v0  ;;  %224 = vst [vmem:[#allocation2 + $0x38] sm:$0xff] (!%p769_p4), %v913_v0 }
  0x13   : > { %225 = vst [vmem:[#allocation2 + $0x40] sm:$0xff] (!%p769_p4), %v913_v0  ;;  %226 = vst [vmem:[#allocation2 + $0x48] sm:$0xff] (!%p769_p4), %v913_v0 }
  0x14   : > { %227 = vst [vmem:[#allocation2 + $0x50] sm:$0xff] %v913_v0  ;;  %228 = vst [vmem:[#allocation2 + $0x58] sm:$0xff] %v913_v0 }
  0x15   : > { %229 = vst [vmem:[#allocation2 + $0x60] sm:$0xff] %v913_v0  ;;  %230 = vst [vmem:[#allocation2 + $0x68] sm:$0xff] %v913_v0 }
  0x16   : > { %231 = vst [vmem:[#allocation2 + $0x70] sm:$0xff] %v913_v0  ;;  %232 = vst [vmem:[#allocation2 + $0x78] sm:$0xff] %v913_v0 }
  0x17 PF: > { %s770_s25 = sshll.u32 %s955_s19, 4  ;;  %v234_v1 = vlaneseq  ;;  %v771_v4 = vld [vmem:[%s1088_s1] ss:$0 sm:$0xff]  ;;  %v243_v10 = vld [vmem:[%s963_s24 + $0x8] sm:$0xff]  ;;  %v914_v11 = vmov 0.0   ;;  %vm318_vm9 = vcmask 130048  }
  0x18   : > { %v237_v2 = vstv %s770_s25  ;;  %v772_v5 = vld [vmem:[%s1089_s2] ss:$0 sm:$0xff]  ;;  %p793_p5 = scmp.ne.s32.totalorder %s955_s19, 3 }
  0x19   : > { %v235_v3 = vshrl.u32 %v234_v1, 7  ;;  %v242_v9 = vld [vmem:[%s963_s24] sm:$0xff]  ;;  %v271_v31 = vld [vmem:[#allocation2 + $0x8] sm:$0xff] }
  0x1a   : > { %v845_v13 = vpack.c.bf16 %v243_v10, %v242_v9  ;;  %v270_v32 = vld [vmem:[#allocation2] sm:$0xff]  ;;  %v273_v37 = vld [vmem:[#allocation2 + $0x18] sm:$0xff]  ;;  %v272_v38 = vld [vmem:[#allocation2 + $0x10] sm:$0xff] }
  0x1b   : > { %v238_v6 = vadd.s32 %v237_v2, %v235_v3  ;;  %v236_v7 = vadd.s32 8, %v235_v3  ;;  %v275_v43 = vld [vmem:[#allocation2 + $0x28] sm:$0xff]  ;;  %v274_v44 = vld [vmem:[#allocation2 + $0x20] sm:$0xff] }
  0x1c   : > { %v277_v49 = vld [vmem:[#allocation2 + $0x38] sm:$0xff]  ;;  %v276_v50 = vld [vmem:[#allocation2 + $0x30] sm:$0xff]  ;;  %v283_v3 = vld [vmem:[#allocation2 + $0x68] sm:$0xff] }
  0x1d   : > { %vm255_vm0 = vcmp.ge.s32.totalorder %v238_v6, %v771_v4  ;;  %vm262_vm1 = vcmp.lt.s32.totalorder %v238_v6, %v772_v5  ;;  %v239_v8 = vadd.s32 %v237_v2, %v236_v7  ;;  %vm240_vm5 = vcmp.lt.s32.totalorder %v238_v6, 61  ;;  %v279_v55 = vld [vmem:[#allocation2 + $0x48] sm:$0xff]  ;;  %v278_v56 = vld [vmem:[#allocation2 + $0x40] sm:$0xff]  ;;  %v285_v9 = vld [vmem:[#allocation2 + $0x78] sm:$0xff] }
  0x1e   : > { %vm264_vm2 = vmand %vm255_vm0, %vm262_vm1  ;;  %v281_v61 = vld [vmem:[#allocation2 + $0x58] sm:$0xff]  ;;  %v280_v62 = vld [vmem:[#allocation2 + $0x50] sm:$0xff] }
  0x1f   : > { %v773_v12 = vsel %vm264_vm2, 1.0, %v914_v11  ;;  %vm256_vm3 = vcmp.ge.s32.totalorder %v239_v8, %v771_v4  ;;  %vm263_vm4 = vcmp.lt.s32.totalorder %v239_v8, %v772_v5  ;;  %vm241_vm7 = vcmp.lt.s32.totalorder %v239_v8, 61  ;;  %v282_v4 = vld [vmem:[#allocation2 + $0x60] sm:$0xff]  ;;  %v284_v10 = vld [vmem:[#allocation2 + $0x70] sm:$0xff] }
  0x20   : > { %286 = vxpose.xlu0.b32.start [1/2] (short) %v773_v12, 128  ;;  %vm265_vm6 = vmand %vm256_vm3, %vm263_vm4 }
  0x21   : > { %v774_v14 = vsel %vm265_vm6, 1.0, %v914_v11  ;;  %vm846_vm8 = vmpackc.low %vm241_vm7, %vm240_vm5 }
  0x22   : > { %847 = vmatprep.subr.msk.bf16.mxu0 %vm846_vm8, %v845_v13  ;;  %851 = vmatprep.subr.msk.bf16.mxu1 %vm846_vm8, %v845_v13 }
  0x23   : > { %850 = vmatpush3.bf16.msk.msra.mxu0 %vm846_vm8, %v845_v13  ;;  %852 = vmatpush3.bf16.msk.msra.mxu1 %vm846_vm8, %v845_v13 }
  0x24   : > { %287 = vxpose.xlu0.b32.end [2/2] (short) %v774_v14, 128 }
  0xa0   : > { %v302_v15 = vpop.trf.xlu0 }
  0xa1   : > { %821 = vmatprep.mubr.msk.f32.mxu0 %vm318_vm9, %v302_v15  ;;  %v566_v15 = vld [vmem:[%s1090_s3 + $0x10] sm:$0xff] (!%p793_p5) }
  0xa4   : > { %v303_v16 = vpop.trf.xlu0 }
  0xa5   : > { %822 = vmatmul.mubr.msk.f32.vlgmr.msra.gmra.mrb[0].mxu0 %vm318_vm9, %v303_v16  ;;  %v564_v16 = vld [vmem:[%s1090_s3] sm:$0xff] (!%p793_p5) }
  0xa8   : > { %v304_v17 = vpop.trf.xlu0 }
  0xa9   : > { %824 = vmatprep.mubr.msk.f32.mxu0 %vm318_vm9, %v304_v17  ;;  %v915_v17 = vmov (!%p793_p5), 0  }
  0xaa   : > { %874 = vset.pattern.permute.xlu1 (!%p793_p5), %v915_v17  ;;  %873 = vset.pattern.permute.xlu0 (!%p793_p5), %v915_v17 }
  0xab   : > { %592 = vperm.xlu1 (!%p793_p5), %874, %v566_v15   ;;  %582 = vperm.xlu0 (!%p793_p5), %873, %v564_v16  }
  0xac   : > { %v305_v18 = vpop.trf.xlu0 }
  0xad   : > { %825 = vmatmul.mubr.msk.f32.gmra.mrb[2].mxu0 %vm318_vm9, %v305_v18  ;;  %v567_v18 = vld [vmem:[%s1090_s3 + $0x18] sm:$0xff] (!%p793_p5) }
  0xaf   : > { %597 = vperm.xlu1 (!%p793_p5), %874, %v567_v18  }
  0xb0   : > { %v306_v19 = vpop.trf.xlu0 }
  0xb1   : > { %827 = vmatprep.mubr.msk.f32.mxu0 %vm318_vm9, %v306_v19  ;;  %v565_v19 = vld [vmem:[%s1090_s3 + $0x8] sm:$0xff] (!%p793_p5) }
  0xb2   : > { %587 = vperm.xlu0 (!%p793_p5), %873, %v565_v19  }
  0xb4   : > { %v307_v20 = vpop.trf.xlu0 }
  0xb5   : > { %828 = vmatmul.mubr.msk.f32.gmra.mrb[4].mxu0 %vm318_vm9, %v307_v20  ;;  %v569_v20 = vld [vmem:[%s1090_s3 + $0x28] sm:$0xff] (!%p793_p5) }
  0xb6   : > { %607 = vperm.xlu1 (!%p793_p5), %874, %v569_v20  }
  0xb8   : > { %v308_v21 = vpop.trf.xlu0 }
  0xb9   : > { %830 = vmatprep.mubr.msk.f32.mxu0 %vm318_vm9, %v308_v21  ;;  %v568_v21 = vld [vmem:[%s1090_s3 + $0x20] sm:$0xff] (!%p793_p5) }
  0xba   : > { %602 = vperm.xlu0 (!%p793_p5), %873, %v568_v21  }
  0xbc   : > { %v309_v22 = vpop.trf.xlu0 }
  0xbd   : > { %831 = vmatmul.mubr.msk.f32.gmra.mrb[6].mxu0 %vm318_vm9, %v309_v22  ;;  %v571_v22 = vld [vmem:[%s1090_s3 + $0x38] sm:$0xff] (!%p793_p5) }
  0xbe   : > { %617 = vperm.xlu1 (!%p793_p5), %874, %v571_v22  }
  0xc0   : > { %v310_v23 = vpop.trf.xlu0 }
  0xc1   : > { %833 = vmatprep.mubr.msk.f32.mxu1 %vm318_vm9, %v310_v23  ;;  %v570_v23 = vld [vmem:[%s1090_s3 + $0x30] sm:$0xff] (!%p793_p5) }
  0xc2   : > { %612 = vperm.xlu0 (!%p793_p5), %873, %v570_v23  }
  0xc4   : > { %v311_v24 = vpop.trf.xlu0 }
  0xc5   : > { %834 = vmatmul.mubr.msk.f32.vlgmr.msra.gmra.mrb[0].mxu1 %vm318_vm9, %v311_v24  ;;  %v573_v24 = vld [vmem:[%s1090_s3 + $0x48] sm:$0xff] (!%p793_p5) }
  0xc6   : > { %627 = vperm.xlu1 (!%p793_p5), %874, %v573_v24  }
  0xc8   : > { %v312_v25 = vpop.trf.xlu0 }
  0xc9   : > { %836 = vmatprep.mubr.msk.f32.mxu1 %vm318_vm9, %v312_v25  ;;  %v572_v25 = vld [vmem:[%s1090_s3 + $0x40] sm:$0xff] (!%p793_p5) }
  0xca   : > { %622 = vperm.xlu0 (!%p793_p5), %873, %v572_v25  }
  0xcc   : > { %v313_v26 = vpop.trf.xlu0 }
  0xcd   : > { %837 = vmatmul.mubr.msk.f32.gmra.mrb[2].mxu1 %vm318_vm9, %v313_v26  ;;  %v575_v26 = vld [vmem:[%s1090_s3 + $0x58] sm:$0xff] (!%p793_p5) }
  0xce   : > { %637 = vperm.xlu1 (!%p793_p5), %874, %v575_v26  }
  0xd0   : > { %v314_v27 = vpop.trf.xlu0 }
  0xd1   : > { %839 = vmatprep.mubr.msk.f32.mxu1 %vm318_vm9, %v314_v27  ;;  %v574_v27 = vld [vmem:[%s1090_s3 + $0x50] sm:$0xff] (!%p793_p5) }
  0xd2   : > { %632 = vperm.xlu0 (!%p793_p5), %873, %v574_v27  }
  0xd4   : > { %v315_v28 = vpop.trf.xlu0 }
  0xd5   : > { %840 = vmatmul.mubr.msk.f32.gmra.mrb[4].mxu1 %vm318_vm9, %v315_v28  ;;  %v577_v28 = vld [vmem:[%s1090_s3 + $0x68] sm:$0xff] (!%p793_p5) }
  0xd6   : > { %647 = vperm.xlu1 (!%p793_p5), %874, %v577_v28  }
  0xd8   : > { %v316_v29 = vpop.trf.xlu0 }
  0xd9   : > { %842 = vmatprep.mubr.msk.f32.mxu1 %vm318_vm9, %v316_v29  ;;  %v576_v29 = vld [vmem:[%s1090_s3 + $0x60] sm:$0xff] (!%p793_p5) }
  0xda   : > { %642 = vperm.xlu0 (!%p793_p5), %873, %v576_v29  }
  0xdc   : > { %v317_v30 = vpop.trf.xlu0 }
  0xdd   : > { %843 = vmatmul.mubr.msk.f32.gmra.mrb[6].mxu1 %vm318_vm9, %v317_v30  ;;  %v579_v30 = vld [vmem:[%s1090_s3 + $0x78] sm:$0xff] (!%p793_p5) }
  0xde   : > { %657 = vperm.xlu1 (!%p793_p5), %874, %v579_v30  }
 0x178   : > { %v823_v33 = vpop.f32.mrb[0].mxu0 }
 0x179   : > { %v513_v34 = vadd.f32 %v823_v33, %v271_v31  ;;  %v433_v35 = vpop.f32.mrb[1].mxu0  ;;  %v578_v31 = vld [vmem:[%s1090_s3 + $0x70] sm:$0xff] (!%p793_p5) }
 0x17a   : > { %v512_v36 = vadd.f32 %v433_v35, %v270_v32  ;;  %652 = vperm.xlu0 (!%p793_p5), %873, %v578_v31   ;;  %v593_v35 = vpop.permute.xlu1 (!%p793_p5), %592 }
 0x17b   : > { %529 = vst [vmem:[#allocation2 + $0x8] sm:$0xff] %v513_v34  ;;  %v1043_v34 = vld [vmem:[%s1091_s4] ss:$0 sm:$0xff] (!%p793_p5) }
 0x17c   : > { %528 = vst [vmem:[#allocation2] sm:$0xff] %v512_v36  ;;  %v583_v36 = vpop.permute.xlu0 (!%p793_p5), %582 }
 0x180   : > { %v826_v39 = vpop.f32.mrb[2].mxu0 }
 0x181   : > { %v515_v40 = vadd.f32 %v826_v39, %v273_v37  ;;  %v443_v41 = vpop.f32.mrb[3].mxu0 }
 0x182   : > { %v514_v42 = vadd.f32 %v443_v41, %v272_v38 }
 0x183   : > { %531 = vst [vmem:[#allocation2 + $0x18] sm:$0xff] %v515_v40  ;;  %v548_v33 = vld [vmem:[#allocation2] sm:$0xff] (!%p793_p5)  ;;  %v549_v40 = vld [vmem:[#allocation2 + $0x8] sm:$0xff] (!%p793_p5) }
 0x184   : > { %530 = vst [vmem:[#allocation2 + $0x10] sm:$0xff] %v514_v42  ;;  %v660_v38 = vmul.f32 (!%p793_p5), %v583_v36, %v548_v33 }
 0x186   : > { %v683_v42 = vmul.f32 (!%p793_p5), %v1043_v34, %v660_v38 }
 0x188   : > { %v829_v45 = vpop.f32.mrb[4].mxu0  ;;  %699 = vst [vmem:[#allocation2] sm:$0xff] (!%p793_p5), %v683_v42 }
 0x189   : > { %v517_v46 = vadd.f32 %v829_v45, %v275_v43  ;;  %v453_v47 = vpop.f32.mrb[5].mxu0  ;;  %v598_v43 = vpop.permute.xlu1 (!%p793_p5), %597 }
 0x18a   : > { %v516_v48 = vadd.f32 %v453_v47, %v274_v44  ;;  %v551_v39 = vld [vmem:[#allocation2 + $0x18] sm:$0xff] (!%p793_p5)  ;;  %v588_v44 = vpop.permute.xlu0 (!%p793_p5), %587 }
 0x18b   : > { %533 = vst [vmem:[#allocation2 + $0x28] sm:$0xff] %v517_v46  ;;  %v550_v32 = vld [vmem:[#allocation2 + $0x10] sm:$0xff] (!%p793_p5)  ;;  %v663_v45 = vmul.f32 (!%p793_p5), %v598_v43, %v551_v39  ;;  %v661_v46 = vmul.f32 (!%p793_p5), %v588_v44, %v549_v40 }
 0x18c   : > { %532 = vst [vmem:[#allocation2 + $0x20] sm:$0xff] %v516_v48  ;;  %v662_v37 = vmul.f32 (!%p793_p5), %v593_v35, %v550_v32 }
 0x18e   : > { %v685_v41 = vmul.f32 (!%p793_p5), %v1043_v34, %v662_v37 }
 0x190   : > { %v832_v51 = vpop.f32.mrb[6].mxu0  ;;  %701 = vst [vmem:[#allocation2 + $0x10] sm:$0xff] (!%p793_p5), %v685_v41 }
 0x191   : > { %v519_v52 = vadd.f32 %v832_v51, %v277_v49  ;;  %v463_v53 = vpop.f32.mrb[7].mxu0  ;;  %v686_v49 = vmul.f32 (!%p793_p5), %v1043_v34, %v663_v45  ;;  %v608_v51 = vpop.permute.xlu1 (!%p793_p5), %607 }
 0x192   : > { %v518_v54 = vadd.f32 %v463_v53, %v276_v50  ;;  %v553_v47 = vld [vmem:[#allocation2 + $0x28] sm:$0xff] (!%p793_p5)  ;;  %v684_v50 = vmul.f32 (!%p793_p5), %v1043_v34, %v661_v46 }
 0x193   : > { %535 = vst [vmem:[#allocation2 + $0x38] sm:$0xff] %v519_v52  ;;  %v552_v48 = vld [vmem:[#allocation2 + $0x20] sm:$0xff] (!%p793_p5)  ;;  %v603_v52 = vpop.permute.xlu0 (!%p793_p5), %602  ;;  %702 = vst [vmem:[#allocation2 + $0x18] sm:$0xff] (!%p793_p5), %v686_v49  ;;  %v665_v53 = vmul.f32 (!%p793_p5), %v608_v51, %v553_v47 }
 0x194   : > { %534 = vst [vmem:[#allocation2 + $0x30] sm:$0xff] %v518_v54  ;;  %700 = vst [vmem:[#allocation2 + $0x8] sm:$0xff] (!%p793_p5), %v684_v50  ;;  %v664_v54 = vmul.f32 (!%p793_p5), %v603_v52, %v552_v48 }
 0x198   : > { %v835_v57 = vpop.f32.mrb[0].mxu1 }
 0x199   : > { %v521_v58 = vadd.f32 %v835_v57, %v279_v55  ;;  %v473_v59 = vpop.f32.mrb[1].mxu1  ;;  %v688_v57 = vmul.f32 (!%p793_p5), %v1043_v34, %v665_v53 }
 0x19a   : > { %v520_v60 = vadd.f32 %v473_v59, %v278_v56  ;;  %v555_v55 = vld [vmem:[#allocation2 + $0x38] sm:$0xff] (!%p793_p5)  ;;  %v618_v59 = vpop.permute.xlu1 (!%p793_p5), %617 }
 0x19b   : > { %537 = vst [vmem:[#allocation2 + $0x48] sm:$0xff] %v521_v58  ;;  %v554_v56 = vld [vmem:[#allocation2 + $0x30] sm:$0xff] (!%p793_p5)  ;;  %v687_v58 = vmul.f32 (!%p793_p5), %v1043_v34, %v664_v54  ;;  %704 = vst [vmem:[#allocation2 + $0x28] sm:$0xff] (!%p793_p5), %v688_v57 }
 0x19c   : > { %536 = vst [vmem:[#allocation2 + $0x40] sm:$0xff] %v520_v60  ;;  %v613_v60 = vpop.permute.xlu0 (!%p793_p5), %612 }
 0x19d   : > { %703 = vst [vmem:[#allocation2 + $0x20] sm:$0xff] (!%p793_p5), %v687_v58 }
 0x1a0   : > { %v838_v63 = vpop.f32.mrb[2].mxu1 }
 0x1a1   : > { %v523_v0 = vadd.f32 %v838_v63, %v281_v61  ;;  %v483_v1 = vpop.f32.mrb[3].mxu1  ;;  %v667_v61 = vmul.f32 (!%p793_p5), %v618_v59, %v555_v55 }
 0x1a2   : > { %v522_v2 = vadd.f32 %v483_v1, %v280_v62  ;;  %v666_v62 = vmul.f32 (!%p793_p5), %v613_v60, %v554_v56  ;;  %v557_v63 = vld [vmem:[#allocation2 + $0x48] sm:$0xff] (!%p793_p5) }
 0x1a3   : > { %539 = vst [vmem:[#allocation2 + $0x58] sm:$0xff] %v523_v0  ;;  %v556_v0 = vld [vmem:[#allocation2 + $0x40] sm:$0xff] (!%p793_p5)  ;;  %v690_v1 = vmul.f32 (!%p793_p5), %v1043_v34, %v667_v61 }
 0x1a4   : > { %538 = vst [vmem:[#allocation2 + $0x50] sm:$0xff] %v522_v2  ;;  %v689_v2 = vmul.f32 (!%p793_p5), %v1043_v34, %v666_v62 }
 0x1a5   : > { %706 = vst [vmem:[#allocation2 + $0x38] sm:$0xff] (!%p793_p5), %v690_v1 }
 0x1a6   : > { %705 = vst [vmem:[#allocation2 + $0x30] sm:$0xff] (!%p793_p5), %v689_v2 }
 0x1a8   : > { %v841_v5 = vpop.f32.mrb[4].mxu1 }
 0x1a9   : > { %v525_v6 = vadd.f32 %v841_v5, %v283_v3  ;;  %v493_v7 = vpop.f32.mrb[5].mxu1  ;;  %v628_v3 = vpop.permute.xlu1 (!%p793_p5), %627 }
 0x1aa   : > { %v524_v8 = vadd.f32 %v493_v7, %v282_v4  ;;  %v623_v4 = vpop.permute.xlu0 (!%p793_p5), %622  ;;  %v669_v5 = vmul.f32 (!%p793_p5), %v628_v3, %v557_v63  ;;  %v559_v7 = vld [vmem:[#allocation2 + $0x58] sm:$0xff] (!%p793_p5) }
 0x1ab   : > { %541 = vst [vmem:[#allocation2 + $0x68] sm:$0xff] %v525_v6  ;;  %v668_v6 = vmul.f32 (!%p793_p5), %v623_v4, %v556_v0 }
 0x1ac   : > { %540 = vst [vmem:[#allocation2 + $0x60] sm:$0xff] %v524_v8  ;;  %v558_v8 = vld [vmem:[#allocation2 + $0x50] sm:$0xff] (!%p793_p5) }
 0x1ae   : > { %547 = sbr.rel (%p793_p5) target bundleno = 511 (0x1ff), region = 48 }
 0x1b0   : > { %v844_v11 = vpop.f32.mrb[6].mxu1 }
 0x1b1   : > { %v527_v12 = vadd.f32 %v844_v11, %v285_v9  ;;  %v503_v13 = vpop.f32.mrb[7].mxu1  ;;  %v692_v9 = vmul.f32 (!%p793_p5), %v1043_v34, %v669_v5  ;;  %v638_v11 = vpop.permute.xlu1 (!%p793_p5), %637 }
 0x1b2   : > { %v526_v14 = vadd.f32 %v503_v13, %v284_v10  ;;  %v691_v10 = vmul.f32 (!%p793_p5), %v1043_v34, %v668_v6  ;;  %v671_v13 = vmul.f32 (!%p793_p5), %v638_v11, %v559_v7  ;;  %v561_v15 = vld [vmem:[#allocation2 + $0x68] sm:$0xff] (!%p793_p5) }
 0x1b3   : > { %543 = vst [vmem:[#allocation2 + $0x78] sm:$0xff] %v527_v12  ;;  %v633_v12 = vpop.permute.xlu0 (!%p793_p5), %632  ;;  %708 = vst [vmem:[#allocation2 + $0x48] sm:$0xff] (!%p793_p5), %v692_v9  ;;  %v560_v16 = vld [vmem:[#allocation2 + $0x60] sm:$0xff] (!%p793_p5) }
 0x1b4   : > { %542 = vst [vmem:[#allocation2 + $0x70] sm:$0xff] %v526_v14  ;;  %707 = vst [vmem:[#allocation2 + $0x40] sm:$0xff] (!%p793_p5), %v691_v10  ;;  %v670_v14 = vmul.f32 (!%p793_p5), %v633_v12, %v558_v8  ;;  %v694_v17 = vmul.f32 (!%p793_p5), %v1043_v34, %v671_v13 }
 0x1b5   : > { %v648_v19 = vpop.permute.xlu1 %647 }
 0x1b6   : > { %v693_v18 = vmul.f32 %v1043_v34, %v670_v14  ;;  %710 = vst [vmem:[#allocation2 + $0x58] sm:$0xff] %v694_v17  ;;  %v673_v21 = vmul.f32 %v648_v19, %v561_v15 }
 0x1b7   : > { %v643_v20 = vpop.permute.xlu0 %642 }
 0x1b8   : > { %709 = vst [vmem:[#allocation2 + $0x50] sm:$0xff] %v693_v18  ;;  %v672_v22 = vmul.f32 %v643_v20, %v560_v16  ;;  %v696_v25 = vmul.f32 %v1043_v34, %v673_v21 }
 0x1b9   : > { %v658_v27 = vpop.permute.xlu1 %657 }
 0x1ba   : > { %v563_v23 = vld [vmem:[#allocation2 + $0x78] sm:$0xff]  ;;  %v695_v26 = vmul.f32 %v1043_v34, %v672_v22  ;;  %712 = vst [vmem:[#allocation2 + $0x68] sm:$0xff] %v696_v25 }
 0x1bb   : > { %v562_v24 = vld [vmem:[#allocation2 + $0x70] sm:$0xff]  ;;  %v675_v29 = vmul.f32 %v658_v27, %v563_v23 }
 0x1bc   : > { %711 = vst [vmem:[#allocation2 + $0x60] sm:$0xff] %v695_v26 }
 0x1bd   : > { %v698_v31 = vmul.f32 %v1043_v34, %v675_v29 }
 0x1bf   : > { %714 = vst [vmem:[#allocation2 + $0x78] sm:$0xff] %v698_v31 }
 0x1f9   : > { %v653_v28 = vpop.permute.xlu0 %652 }
 0x1fa   : > { %v674_v30 = vmul.f32 %v653_v28, %v562_v24 }
 0x1fc   : > { %v697_v32 = vmul.f32 %v1043_v34, %v674_v30 }
 0x1fe   : > { %713 = vst [vmem:[#allocation2 + $0x70] sm:$0xff] %v697_v32 }
 0x1ff PF: > { %p857_p6 = scmp.eq.s32.totalorder %s955_s19, 3  ;;  %s916_s16 = smov [#allocation2]  }
 0x200   : > { %s721_s17 = sshll.u32 %s916_s16, 4  ;;  %s722_s17 = int_to_ptr.vmem [resolvable:$true] %s721_s17 }
 0x201   : > { %s875_s20 = scalar_lea.vmem %s722_s17, 2048  ;;  %p882_p10 = scmp.lt.s32.totalorder %s722_s17, %s722_s17 }
 0x202   : > { %p876_p7 = scmp.ne.s32.totalorder %s722_s17, %s875_s20  ;;  %p883_p11 = scmp.lt.s32.totalorder %s875_s20, %s875_s20 }
 0x204   : > { %p877_p8 = pnand %p876_p7, %p857_p6  ;;  %p884_p12 = por %p883_p11, %p882_p10 }
 0x206   : > { %p878_p9 = pneg %p877_p8 }
 0x208   : > { %p885_p13 = pnand %p884_p12, %p878_p9 }
 0x20a   : > { %888 = shalt.err (!%p885_p13)
}
 0x20b   : > { %s889_s23 = scalar_lea.hbm %s1092_s5, 2048 }
 0x20c   : > { %p890_p0 = scmp.ne.s32.totalorder %s1092_s5, %s889_s23  ;;  %p895_p3 = scmp.lt.u32.totalorder %s889_s23, %s1092_s5 }
 0x20e   : > { %p891_p1 = pnand %p890_p0, %p857_p6 }
 0x210   : > { %p892_p2 = pneg %p891_p1 }
 0x212   : > { %p897_p4 = pnand %p895_p3, %p892_p2 }
 0x214   : > { %900 = shalt.err (!%p897_p4)
}
 0x215   : > { %s917_s28 = smov 128   ;;  %s918_s29 = smov 8  }
 0x216   : > { %854 = dma.vmem_to_hbm [thread:$0]  (%p857_p6), %s722_s17, 2048, %s1092_s5, [#allocation3], %s917_s28, %s917_s28, %s918_s29  }
 0x217   : > { %906 = dma.done.wait (%p857_p6), [#allocation3], 2048  }
 0x218   : > { %908 = vsyncadd (%p857_p6), [#allocation3], 4294965248 }
 0x219 PF: > { %s16_s18 = sadd.s32 1, %s911_s18  }
 0x21a   : > { %p13_p5 = scmp.ge.s32.totalorder %s16_s18, 6  }
 0x21c   :  { %15 = sbr.rel (!%p13_p5) target bundleno = 1 (0x1), region = 75 }
 0x223   :  { %737 = vsyncpa [#allocation3], 1 }
 0x224   :  { %739 = vsyncpa [#allocation3 + $0x1], 1 }

</bundles_post_ra>
